<compile_context>
chip_gen: v7x
topology: tpu7x:2x2x1
jax: 0.10.0
libtpu: 0.0.40
codegen_flags: <defaults>
</compile_context>

<pallas_src>
import jax
import jax.numpy as jnp
from jax import lax
from jax.experimental import pallas as pl
from jax.experimental.pallas import tpu as pltpu

LANE = 128              # TPU lane width
TILE_B_MAX = 8192       # x block = 4 MiB lane-padded in VMEM (x2 buffers) at this size
SINGLE_TILE_MAX = 1024  # below this, one tile: per-step overhead > split benefit
SMALL_B_JNP = 16        # act()/single-step path: plain fused XLA has lower latency


def _round_up(v: int, m: int) -> int:
    return -(-v // m) * m


def _pick_tile_b(batch: int) -> int:
    """Lane-aligned batch tile; >= 2 tiles for large batches (v7x megacore)."""
    bp = _round_up(batch, LANE)
    if bp <= SINGLE_TILE_MAX:
        return bp
    return min(TILE_B_MAX, _round_up(bp // 2, LANE))


def _mlp_kernel(x_ref, w1_ref, b1_ref, w2_ref, b2_ref, out_ref):
    # x: (tb, 4)  w1: (64, 4)  b1: (64, 1)  w2: (2, 64)  b2: (2, 1)  out: (2, tb)
    # Layer 1 on the MXU as a q.k^T-style contraction over the 4 features:
    #   h[j, b] = sum_k w1[j, k] * x[b, k]   -> (64, tb), batch on the lane axis.
    h = lax.dot_general(
        w1_ref[...], x_ref[...],
        dimension_numbers=(((1,), (1,)), ((), ())),
        preferred_element_type=jnp.float32,
        precision=lax.Precision.HIGHEST)
    h = jnp.tanh(h + b1_ref[...])                       # (64, tb) on the EUP, f32
    # Layer 2 on the MXU: (2, 64) @ (64, tb) -> (2, tb), lane-dense stores.
    y = jnp.dot(w2_ref[...], h,
                preferred_element_type=jnp.float32,
                precision=lax.Precision.HIGHEST) + b2_ref[...]
    out_ref[...] = y.astype(out_ref.dtype)


def network_forward(x, w1, b1, w2, b2, *, transposed_out=False, use_pallas=None):
    """Forward pass of Network: tanh(x @ w1.T + b1) @ w2.T + b2.

    x : (B, 4) float32 (PyTorch layout).  Params in nn.Linear layout:
      w1: (64, 4), b1: (64,), w2: (2, 64), b2: (2,).
    Returns (B, 2) by default; transposed_out=True returns the kernel's native
    lane-dense (2, B) slab without the extra transpose pass.
    """
    batch = x.shape[0]
    if use_pallas is None:
        use_pallas = batch >= SMALL_B_JNP
    x = x.astype(jnp.float32)

    if not use_pallas:
        # Single-env act()/inference path (B = 1..8): fused XLA beats the
        # pallas_call + slice chain on latency.
        y = jnp.tanh(x @ w1.T + b1) @ w2.T + b2
        return y.T if transposed_out else y

    tb = _pick_tile_b(batch)
    bk = _round_up(batch, tb)            # == batch for tile-aligned B (no copy)
    if bk != batch:
        x = jnp.pad(x, ((0, bk - batch), (0, 0)))
    n_tiles = bk // tb

    w1c = w1.astype(jnp.float32)
    w2c = w2.astype(jnp.float32)
    b1c = b1.reshape(64, 1).astype(jnp.float32)
    b2c = b2.reshape(2, 1).astype(jnp.float32)

    yt = pl.pallas_call(
        _mlp_kernel,
        out_shape=jax.ShapeDtypeStruct((2, bk), jnp.float32),
        grid=(n_tiles,),
        in_specs=[
            pl.BlockSpec((tb, 4), lambda i: (i, 0)),   # activations, tiled over batch
            pl.BlockSpec((64, 4), lambda i: (0, 0)),   # weights pinned (VMEM-resident)
            pl.BlockSpec((64, 1), lambda i: (0, 0)),
            pl.BlockSpec((2, 64), lambda i: (0, 0)),
            pl.BlockSpec((2, 1), lambda i: (0, 0)),
        ],
        out_specs=pl.BlockSpec((2, tb), lambda i: (0, i)),
        compiler_params=pltpu.CompilerParams(
            dimension_semantics=("parallel",),          # megacore split on v7x
            vmem_limit_bytes=32 * 1024 * 1024,
        ),
    )(x, w1c, b1c, w2c, b2c)

    if bk != batch:
        yt = yt[:, :batch]
    return yt if transposed_out else yt.T


def init_params(key):
    """PyTorch-style init: U(-1/sqrt(fan_in), 1/sqrt(fan_in)), nn.Linear layout."""
    k1, k2, k3, k4 = jax.random.split(key, 4)
    bound1 = 1.0 / jnp.sqrt(4.0)
    bound2 = 1.0 / jnp.sqrt(64.0)
    w1 = jax.random.uniform(k1, (64, 4), jnp.float32, -bound1, bound1)
    b1 = jax.random.uniform(k2, (64,), jnp.float32, -bound1, bound1)
    w2 = jax.random.uniform(k3, (2, 64), jnp.float32, -bound2, bound2)
    b2 = jax.random.uniform(k4, (2,), jnp.float32, -bound2, bound2)
    return w1, b1, w2, b2


# TODO(synk): Network.act() is an empty stub (`pass`) in the source module — nothing to port.

if __name__ == "__main__":
    jax.config.update("jax_default_matmul_precision", "highest")

    key = jax.random.PRNGKey(0)
    kx, kp = jax.random.split(key)
    w1, b1, w2, b2 = init_params(kp)

    fwd = jax.jit(network_forward, static_argnames=("transposed_out", "use_pallas"))

    def ref_fn(x):
        return jnp.tanh(x @ w1.T + b1) @ w2.T + b2

    # DQN replay minibatch: single tile, tile-aligned -> zero-copy input path.
    x256 = jax.random.normal(kx, (256, 4), jnp.float32)
    out = jax.block_until_ready(fwd(x256, w1, b1, w2, b2))
    assert out.shape == (256, 2)
    assert jnp.allclose(out, ref_fn(x256), atol=1e-5, rtol=1e-5)

    # Larger eval batch: two tiles -> grid actually splits (megacore on v7x).
    x2k = jax.random.normal(jax.random.PRNGKey(1), (2048, 4), jnp.float32)
    out2k = jax.block_until_ready(fwd(x2k, w1, b1, w2, b2))
    assert out2k.shape == (2048, 2)
    assert jnp.allclose(out2k, ref_fn(x2k), atol=1e-5, rtol=1e-5)

    # Non-128-aligned batch exercises the (cheap, rare) pad path; transposed
    # output skips the final (2,B)->(B,2) XLA transpose for layout-aware users.
    x200 = jax.random.normal(jax.random.PRNGKey(2), (200, 4), jnp.float32)
    out_t = jax.block_until_ready(fwd(x200, w1, b1, w2, b2, transposed_out=True))
    assert out_t.shape == (2, 200)
    assert jnp.allclose(out_t.T, ref_fn(x200), atol=1e-5, rtol=1e-5)

    # Single-env act()-style call: tiny batch goes through the plain-XLA path.
    x5 = jax.random.normal(jax.random.PRNGKey(3), (5, 4), jnp.float32)
    out5 = jax.block_until_ready(fwd(x5, w1, b1, w2, b2))
    assert out5.shape == (5, 2)
    assert jnp.allclose(out5, ref_fn(x5), atol=1e-5, rtol=1e-5)

    print("KERNEL_OK")
</pallas_src>

<mosaic_0001>
module attributes {stable_mosaic.version = 11 : i64} {
  func.func @_mlp_kernel(%arg0: i32, %arg1: memref<256x4xf32, #tpu.memory_space<vmem>>, %arg2: memref<64x4xf32, #tpu.memory_space<vmem>>, %arg3: memref<64x1xf32, #tpu.memory_space<vmem>>, %arg4: memref<2x64xf32, #tpu.memory_space<vmem>>, %arg5: memref<2x1xf32, #tpu.memory_space<vmem>>, %arg6: memref<2x256xf32, #tpu.memory_space<vmem>>) attributes {dimension_semantics = [#tpu.dimension_semantics<parallel>], iteration_bounds = array<i64: 1>, scalar_prefetch = 0 : i64, scratch_operands = 0 : i64, tpu.core_type = #tpu.core_type<tc>, window_params = [{transform_indices = @transform_0, window_bounds = array<i64: 256, 4>}, {pipeline_mode = #tpu.pipeline_mode<synchronous>, transform_indices = @transform_1, window_bounds = array<i64: 64, 4>}, {pipeline_mode = #tpu.pipeline_mode<synchronous>, transform_indices = @transform_2, window_bounds = array<i64: 64, 1>}, {pipeline_mode = #tpu.pipeline_mode<synchronous>, transform_indices = @transform_3, window_bounds = array<i64: 2, 64>}, {pipeline_mode = #tpu.pipeline_mode<synchronous>, transform_indices = @transform_4, window_bounds = array<i64: 2, 1>}, {transform_indices = @transform_5, window_bounds = array<i64: 2, 256>}]} {
    %c0 = arith.constant 0 : index
    %c0_0 = arith.constant 0 : index
    %0 = vector.load %arg2[%c0, %c0_0] : memref<64x4xf32, #tpu.memory_space<vmem>>, vector<64x4xf32>
    %c0_1 = arith.constant 0 : index
    %c0_2 = arith.constant 0 : index
    %1 = vector.load %arg1[%c0_1, %c0_2] : memref<256x4xf32, #tpu.memory_space<vmem>>, vector<256x4xf32>
    %cst = arith.constant dense<0.000000e+00> : vector<64x256xf32>
    %2 = tpu.matmul %0, %1, %cst {dimension_numbers = #tpu.dot_dimension_numbers<[1], [1], [0], [0], [0, 0, 1, 0], [], []>, precision = #tpu.contract_precision<fp32>} : vector<64x4xf32>, vector<256x4xf32>, vector<64x256xf32> -> vector<64x256xf32>
    %c0_3 = arith.constant 0 : index
    %c0_4 = arith.constant 0 : index
    %3 = vector.load %arg3[%c0_3, %c0_4] : memref<64x1xf32, #tpu.memory_space<vmem>>, vector<64x1xf32>
    %4 = vector.broadcast %3 : vector<64x1xf32> to vector<64x256xf32>
    %5 = arith.addf %2, %4 : vector<64x256xf32>
    %6 = math.tanh %5 : vector<64x256xf32>
    %c0_5 = arith.constant 0 : index
    %c0_6 = arith.constant 0 : index
    %7 = vector.load %arg4[%c0_5, %c0_6] : memref<2x64xf32, #tpu.memory_space<vmem>>, vector<2x64xf32>
    %cst_7 = arith.constant dense<0.000000e+00> : vector<2x256xf32>
    %8 = tpu.matmul %7, %6, %cst_7 {dimension_numbers = #tpu.dot_dimension_numbers<[1], [0], [0], [1], [0, 0, 1, 1], [], []>, precision = #tpu.contract_precision<fp32>} : vector<2x64xf32>, vector<64x256xf32>, vector<2x256xf32> -> vector<2x256xf32>
    %c0_8 = arith.constant 0 : index
    %c0_9 = arith.constant 0 : index
    %9 = vector.load %arg5[%c0_8, %c0_9] : memref<2x1xf32, #tpu.memory_space<vmem>>, vector<2x1xf32>
    %10 = vector.broadcast %9 : vector<2x1xf32> to vector<2x256xf32>
    %11 = arith.addf %8, %10 : vector<2x256xf32>
    %c0_10 = arith.constant 0 : index
    %c0_11 = arith.constant 0 : index
    %12 = vector.load %arg6[%c0_10, %c0_11] : memref<2x256xf32, #tpu.memory_space<vmem>>, vector<2x256xf32>
    tpu.vector_store %arg6[%c0_10, %c0_11], %11 {strides = array<i32>} : memref<2x256xf32, #tpu.memory_space<vmem>>, vector<2x256xf32>,
    return
  }
  func.func @transform_0(%arg0: i32) -> (i32, i32) {
    %c0_i32 = arith.constant 0 : i32
    %c0_i32_0 = arith.constant 0 : i32
    return %arg0, %c0_i32 : i32, i32
  }
  func.func @transform_1(%arg0: i32) -> (i32, i32) {
    %c0_i32 = arith.constant 0 : i32
    %c0_i32_0 = arith.constant 0 : i32
    %c0_i32_1 = arith.constant 0 : i32
    return %c0_i32, %c0_i32_0 : i32, i32
  }
  func.func @transform_2(%arg0: i32) -> (i32, i32) {
    %c0_i32 = arith.constant 0 : i32
    %c0_i32_0 = arith.constant 0 : i32
    %c0_i32_1 = arith.constant 0 : i32
    return %c0_i32, %c0_i32_0 : i32, i32
  }
  func.func @transform_3(%arg0: i32) -> (i32, i32) {
    %c0_i32 = arith.constant 0 : i32
    %c0_i32_0 = arith.constant 0 : i32
    %c0_i32_1 = arith.constant 0 : i32
    return %c0_i32, %c0_i32_0 : i32, i32
  }
  func.func @transform_4(%arg0: i32) -> (i32, i32) {
    %c0_i32 = arith.constant 0 : i32
    %c0_i32_0 = arith.constant 0 : i32
    %c0_i32_1 = arith.constant 0 : i32
    return %c0_i32, %c0_i32_0 : i32, i32
  }
  func.func @transform_5(%arg0: i32) -> (i32, i32) {
    %c0_i32 = arith.constant 0 : i32
    %c0_i32_0 = arith.constant 0 : i32
    return %c0_i32, %arg0 : i32, i32
  }
}

</mosaic_0001>

<bundles_post_ra>
// kernel: network_forward.1
= control target key start
LH: loop header
LB: loop body
LE: loop exit
PB: predicated region body
PF: predicated region fallthrough
CT: control target
= control target key end

     0   :  { %vm109_vm0 = vcmask 31744   ;;  %s4020_s0 = inlined_call_operand.vmem [shape: f32[256,4], index: 0, kind: input, shape index: {}]   ;;  %s4021_s1 = inlined_call_operand.vmem [shape: f32[64,4], index: 1, kind: input, shape index: {}]   ;;  %s4022_s2 = inlined_call_operand.vmem [shape: f32[64,1], index: 2, kind: input, shape index: {}]   ;;  %s4023_s3 = inlined_call_operand.vmem [shape: f32[2,64], index: 3, kind: input, shape index: {}]   ;;  %s4024_s4 = inlined_call_operand.vmem [shape: f32[2,1], index: 4, kind: input, shape index: {}]   ;;  %s4025_s5 = inlined_call_operand.hbm [shape: f32[2,256], index: 5, kind: output, shape index: {}]  }
   0x1   :  { %v45_v0 = vld [vmem:[%s4020_s0 + $0x80] sm:$0xff]  ;;  %v46_v1 = vld [vmem:[%s4020_s0 + $0x88] sm:$0xff]  ;;  %v47_v7 = vld [vmem:[%s4020_s0 + $0x90] sm:$0xff] }
   0x2   :  { %v29_v2 = vld [vmem:[%s4020_s0] sm:$0xff]  ;;  %v2917_v3 = vsel %vm109_vm0, %v45_v0, 0  ;;  %v2920_v4 = vsel %vm109_vm0, %v46_v1, 0  ;;  %v30_v5 = vld [vmem:[%s4020_s0 + $0x8] sm:$0xff]  ;;  %v48_v8 = vld [vmem:[%s4020_s0 + $0x98] sm:$0xff]  ;;  %v2948_v16 = vsel %vm109_vm0, %v47_v7, 0 }
   0x3   :  { %v2926_v6 = vsel %vm109_vm0, %v29_v2, 0  ;;  %v279_v9 = vand.u32 4294901760, %v2917_v3  ;;  %v282_v10 = vand.u32 4294901760, %v2920_v4  ;;  %v2937_v11 = vsel %vm109_vm0, %v30_v5, 0  ;;  %v31_v13 = vld [vmem:[%s4020_s0 + $0x10] sm:$0xff]  ;;  %v32_v14 = vld [vmem:[%s4020_s0 + $0x18] sm:$0xff] }
   0x4   :  { %v231_v12 = vand.u32 4294901760, %v2926_v6  ;;  %v234_v15 = vand.u32 4294901760, %v2937_v11  ;;  %v2951_v17 = vsel %vm109_vm0, %v48_v8, 0  ;;  %v2954_v18 = vsel %vm109_vm0, %v31_v13, 0  ;;  %v49_v27 = vld [vmem:[%s4020_s0 + $0xa0] sm:$0xff]  ;;  %v50_v28 = vld [vmem:[%s4020_s0 + $0xa8] sm:$0xff] }
   0x5   :  { %v2959_v19 = vsub.f32 %v2917_v3, %v279_v9  ;;  %v2964_v20 = vsub.f32 %v2920_v4, %v282_v10  ;;  %v285_v22 = vand.u32 4294901760, %v2948_v16  ;;  %v4039_v24 = vand.u32 4294901760, %v2951_v17  ;;  %v33_v34 = vld [vmem:[%s4020_s0 + $0x20] sm:$0xff]  ;;  %v34_v35 = vld [vmem:[%s4020_s0 + $0x28] sm:$0xff]  ;;  %v51_v40 = vld [vmem:[%s4020_s0 + $0xb0] sm:$0xff] }
   0x6   :  { %v2969_v21 = vsub.f32 %v2926_v6, %v231_v12  ;;  %v2975_v23 = vsub.f32 %v2937_v11, %v234_v15  ;;  %v2979_v25 = vsel %vm109_vm0, %v32_v14, 0  ;;  %v4036_v26 = vand.u32 4294901760, %v2954_v18  ;;  %v52_v41 = vld [vmem:[%s4020_s0 + $0xb8] sm:$0xff]  ;;  %v35_v47 = vld [vmem:[%s4020_s0 + $0x30] sm:$0xff]  ;;  %v53_v58 = vld [vmem:[%s4020_s0 + $0xc0] sm:$0xff] }
   0x7   :  { %v2481_v29 = vpack.c.bf16 %v2964_v20, %v2959_v19  ;;  %v2993_v30 = vsub.f32 %v2948_v16, %v285_v22  ;;  %v4035_v31 = vand.u32 4294901760, %v2979_v25  ;;  %v3001_v33 = vsub.f32 %v2951_v17, %v4039_v24  ;;  %v36_v48 = vld [vmem:[%s4020_s0 + $0x38] sm:$0xff] }
   0x8   :  { %v2483_v32 = vpack.c.bf16 %v2975_v23, %v2969_v21  ;;  %v3012_v36 = vsub.f32 %v2954_v18, %v4036_v26  ;;  %v3020_v38 = vsel %vm109_vm0, %v49_v27, 0  ;;  %v3023_v39 = vsel %vm109_vm0, %v50_v28, 0 }
   0x9   :  { %2482 = vmatprep.subr.bf16.mxu0 %v2481_v29  ;;  %v3017_v37 = vsub.f32 %v2979_v25, %v4035_v31  ;;  %v2485_v42 = vpack.c.bf16 %v3001_v33, %v2993_v30  ;;  %v4034_v43 = vand.u32 4294901760, %v3020_v38  ;;  %v4032_v44 = vand.u32 4294901760, %v3023_v39 }
   0xa   :  { %2484 = vmatpush3.bf16.xpose.msra.mxu0 %v2483_v32  ;;  %v3036_v45 = vsel %vm109_vm0, %v33_v34, 0  ;;  %v3039_v46 = vsel %vm109_vm0, %v34_v35, 0  ;;  %v3058_v51 = vsel %vm109_vm0, %v51_v40, 0  ;;  %v3061_v52 = vsel %vm109_vm0, %v52_v41, 0 }
   0xb   :  { %2486 = vmatprep.subr.bf16.mxu0 %v2485_v42  ;;  %v3050_v49 = vsub.f32 %v3020_v38, %v4034_v43  ;;  %v3055_v50 = vsub.f32 %v3023_v39, %v4032_v44  ;;  %v2487_v53 = vpack.c.bf16 %v3017_v37, %v3012_v36  ;;  %v4031_v54 = vand.u32 4294901760, %v3036_v45 }
   0xc   :  { %v4030_v55 = vand.u32 4294901760, %v3039_v46  ;;  %v3068_v56 = vsel %vm109_vm0, %v35_v47, 0  ;;  %v3071_v57 = vsel %vm109_vm0, %v36_v48, 0  ;;  %v4029_v60 = vand.u32 4294901760, %v3058_v51 }
   0xd   :  { %v2489_v59 = vpack.c.bf16 %v3055_v50, %v3050_v49  ;;  %v4028_v61 = vand.u32 4294901760, %v3061_v52 }
   0xe   :  { %10 = vsyncpa [#allocation3], 0  ;;  %v54_v62 = vld [vmem:[%s4020_s0 + $0xc8] sm:$0xff]  ;;  %v4027_v63 = vand.u32 4294901760, %v3068_v56  ;;  %v4026_v0 = vand.u32 4294901760, %v3071_v57  ;;  %v3086_v1 = vsel %vm109_vm0, %v53_v58, 0  ;;  %v3094_v5 = vsub.f32 %v3036_v45, %v4031_v54 }
   0xf   :  { %v37_v2 = vld [vmem:[%s4020_s0 + $0x40] sm:$0xff]  ;;  %v3099_v7 = vsub.f32 %v3039_v46, %v4030_v55  ;;  %v3104_v8 = vsub.f32 %v3058_v51, %v4029_v60  ;;  %v3109_v13 = vsub.f32 %v3061_v52, %v4028_v61  ;;  %v3112_v14 = vsel %vm109_vm0, %v54_v62, 0  ;;  %v38_v27 = vld [vmem:[%s4020_s0 + $0x48] sm:$0xff]  ;;  %v55_v35 = vld [vmem:[%s4020_s0 + $0xd0] sm:$0xff] }
  0x10   :  { %v4033_v28 = vand.u32 4294901760, %v3086_v1  ;;  %v3119_v29 = vsel %vm109_vm0, %v37_v2, 0  ;;  %v3124_v32 = vsub.f32 %v3068_v56, %v4027_v63  ;;  %v3129_v34 = vsub.f32 %v3071_v57, %v4026_v0  ;;  %v56_v40 = vld [vmem:[%s4020_s0 + $0xd8] sm:$0xff]  ;;  %v39_v48 = vld [vmem:[%s4020_s0 + $0x50] sm:$0xff]  ;;  %v57_v62 = vld [vmem:[%s4020_s0 + $0xe0] sm:$0xff] }
  0x11   :  { %v2491_v41 = vpack.c.bf16 %v3099_v7, %v3094_v5  ;;  %v4037_v42 = vand.u32 4294901760, %v3112_v14  ;;  %v3141_v47 = vsel %vm109_vm0, %v38_v27, 0  ;;  %v2493_v58 = vpack.c.bf16 %v3109_v13, %v3104_v8  ;;  %v58_v2 = vld [vmem:[%s4020_s0 + $0xe8] sm:$0xff]  ;;  %v41_v27 = vld [vmem:[%s4020_s0 + $0x60] sm:$0xff]  ;;  %v43_v24 = vld [vmem:[%s4020_s0 + $0x70] sm:$0xff] }
  0x12   :  { %2488 = vmatpush3.bf16.xpose.msra.mxu0 %v2487_v53  ;;  %v40_v53 = vld [vmem:[%s4020_s0 + $0x58] sm:$0xff]  ;;  %v3164_v0 = vsub.f32 %v3086_v1, %v4033_v28  ;;  %v3167_v63 = vsel %vm109_vm0, %v55_v35, 0  ;;  %v3170_v61 = vsel %vm109_vm0, %v56_v40, 0  ;;  %v42_v60 = vld [vmem:[%s4020_s0 + $0x68] sm:$0xff]  ;;  %v2495_v55 = vpack.c.bf16 %v3129_v34, %v3124_v32  ;;  %v59_v35 = vld [vmem:[%s4020_s0 + $0xf0] sm:$0xff] }
  0x13   :  { %2490 = vmatprep.subr.bf16.mxu0 %v2489_v59  ;;  %v4038_v59 = vand.u32 4294901760, %v3119_v29  ;;  %v3179_v44 = vsel %vm109_vm0, %v39_v48, 0  ;;  %v3182_v28 = vsel %vm109_vm0, %v40_v53, 0  ;;  %v60_v40 = vld [vmem:[%s4020_s0 + $0xf8] sm:$0xff]  ;;  %v3193_v43 = vsub.f32 %v3112_v14, %v4037_v42 }
  0x14   :  { %4059 = vst [vmem:[#allocation5_spill] sm:$0xff] %v3182_v28  ;;  %v3196_v48 = vsel %vm109_vm0, %v57_v62, 0  ;;  %v3199_v53 = vsel %vm109_vm0, %v58_v2, 0  ;;  %v3202_v31 = vsel %vm109_vm0, %v41_v27, 0  ;;  %v3212_v54 = vsel %vm109_vm0, %v42_v60, 0  ;;  %v21_v62 = vld [vmem:[%s4021_s1] sm:$0xff] }
  0x15   :  { %4060 = vst [vmem:[#allocation6_spill] sm:$0xff] %v3196_v48  ;;  %4061 = vst [vmem:[#allocation7_spill] sm:$0xff] %v3199_v53  ;;  %v3207_v26 = vsub.f32 %v3119_v29, %v4038_v59  ;;  %v3220_v27 = vsel %vm109_vm0, %v59_v35, 0  ;;  %v3223_v59 = vsel %vm109_vm0, %v60_v40, 0  ;;  %v3238_v35 = vpack.c.bf16 %v282_v10, %v279_v9 }
  0x16   :  { %4062 = vst [vmem:[#allocation8_spill] sm:$0xff] %v3202_v31  ;;  %4063 = vst [vmem:[#allocation9_spill] sm:$0xff] %v3212_v54  ;;  %v3245_v60 = vpack.c.bf16 %v234_v15, %v231_v12  ;;  %v111_v42 = vsel %vm109_vm0, %v21_v62, 0  ;;  %v2497_v3 = vpack.c.bf16 %v3193_v43, %v3164_v0  ;;  %v4071_v10 = vand.u32 4294901760, %v3141_v47 }
  0x17   :  { %4064 = vst [vmem:[#allocation10_spill] sm:$0xff] %v3220_v27  ;;  %4065 = vst [vmem:[#allocation11_spill] sm:$0xff] %v3223_v59  ;;  %2418 = vmatprep.subr.bf16.mxu1 %v3238_v35  ;;  %v3259_v6 = vand.u32 4294901760, %v111_v42  ;;  %v4072_v12 = vand.u32 4294901760, %v3167_v63  ;;  %v3272_v16 = vsel %vm109_vm0, %v43_v24, 0  ;;  %v4076_v62 = vand.u32 4294901760, %v3179_v44 }
  0x18   :  { %4066 = vst [vmem:[#allocation12_spill] sm:$0xff] %v3238_v35  ;;  %4067 = vst [vmem:[#allocation13_spill] sm:$0xff] %v3245_v60  ;;  %v3264_v11 = vsub.f32 %v3141_v47, %v4071_v10  ;;  %2420 = vmatpush3.bf16.xpose.msra.mxu1 %v3245_v60  ;;  %v4078_v9 = vand.u32 4294901760, %v3196_v48  ;;  %v4079_v4 = vand.u32 4294901760, %v3199_v53  ;;  %v4081_v40 = vand.u32 4294901760, %v3202_v31 }
  0x19   :  { %4070 = vst [vmem:[#allocation15_spill] sm:$0xff] %v3259_v6  ;;  %v3269_v15 = vsub.f32 %v3167_v63, %v4072_v12  ;;  %4073 = vst [vmem:[#allocation16_spill] sm:$0xff] %v3272_v16  ;;  %v3286_v10 = vsub.f32 %v3179_v44, %v4076_v62  ;;  %v4077_v12 = vand.u32 4294901760, %v3182_v28  ;;  %v4088_v60 = vand.u32 4294901760, %v3023_v39 }
  0x1a   :  { %2492 = vmatpush3.bf16.xpose.msra.mxu0 %v2491_v41  ;;  %v4068_v41 = vand.u32 4294901760, %v2951_v17  ;;  %v3305_v62 = vsub.f32 %v3199_v53, %v4079_v4  ;;  %v4091_v53 = vand.u32 4294901760, %v3036_v45  ;;  %v4096_v45 = vand.u32 4294901760, %v3068_v56 }
  0x1b   :  { %2494 = vmatprep.subr.bf16.mxu0 %v2493_v58  ;;  %v44_v58 = vld [vmem:[%s4020_s0 + $0x78] sm:$0xff]  ;;  %v3291_v24 = vsub.f32 %v3182_v28, %v4077_v12  ;;  %v3310_v12 = vsub.f32 %v3202_v31, %v4081_v40  ;;  %v4094_v31 = vand.u32 4294901760, %v3058_v51  ;;  %vm1451_vm1 = vcmask 523264  }
  0x1c   :  { %v3252_v2 = vpack.c.bf16 %v4068_v41, %v285_v22  ;;  %v3275_v17 = vsel %vm109_vm0, %v44_v58, 0  ;;  %v4075_v22 = vand.u32 4294901760, %v3170_v61  ;;  %v3294_v58 = vsub.f32 %v111_v42, %v3259_v6  ;;  %4080 = vst [vmem:[#allocation18_spill] sm:$0xff] %v3305_v62 }
  0x1d   :  { %4074 = vst [vmem:[#allocation17_spill] sm:$0xff] %v3275_v17  ;;  %v4082_v42 = vand.u32 4294901760, %v3212_v54 }
  0x1e   :  { %4069 = vst [vmem:[#allocation14_spill] sm:$0xff] %v3252_v2  ;;  %v3281_v41 = vsub.f32 %v3170_v61, %v4075_v22  ;;  %2422 = vmatprep.subr.bf16.mxu1 %v3252_v2  ;;  %v3300_v22 = vsub.f32 %v3196_v48, %v4078_v9  ;;  %v4084_v2 = vand.u32 4294901760, %v3223_v59  ;;  %2257 = vmatprep.mubr.f32.mxu0 %v3294_v58  ;;  %v4092_v48 = vand.u32 4294901760, %v3039_v46 }
  0x1f   :  { %v3315_v6 = vsub.f32 %v3212_v54, %v4082_v42  ;;  %v4085_v42 = vand.u32 4294901760, %v2954_v18  ;;  %v4097_v46 = vand.u32 4294901760, %v3071_v57 }
  0x20   :  { %v3325_v4 = vsub.f32 %v3223_v59, %v4084_v2  ;;  %v2499_v2 = vpack.c.bf16 %v3264_v11, %v3207_v26  ;;  %v4087_v59 = vand.u32 4294901760, %v3020_v38  ;;  %v2501_v18 = vpack.c.bf16 %v3281_v41, %v3269_v15 }
  0x21   :  { %v4089_v38 = vand.u32 4294901760, %v3272_v16 }
  0x22   :  { %2496 = vmatpush3.bf16.xpose.msra.mxu0 %v2495_v55  ;;  %v4083_v55 = vand.u32 4294901760, %v3220_v27  ;;  %v3344_v40 = vpack.c.bf16 %v4088_v60, %v4087_v59  ;;  %v4090_v59 = vand.u32 4294901760, %v3275_v17 }
  0x23   :  { %2498 = vmatprep.subr.bf16.mxu0 %v2497_v3  ;;  %v4086_v3 = vand.u32 4294901760, %v2979_v25  ;;  %v2503_v25 = vpack.c.bf16 %v3291_v24, %v3286_v10  ;;  %v3359_v39 = vsub.f32 %v3272_v16, %v4089_v38  ;;  %v3380_v38 = vand.u32 4294901760, %v3294_v58 }
  0x24   :  { %v3320_v9 = vsub.f32 %v3220_v27, %v4083_v55  ;;  %v418_v55 = vand.u32 4294901760, %v2969_v21  ;;  %v425_v27 = vand.u32 4294901760, %v2975_v23  ;;  %v3364_v60 = vsub.f32 %v3275_v17, %v4090_v59 }
  0x25   :  { %v3334_v54 = vpack.c.bf16 %v4086_v3, %v4085_v42  ;;  %v2505_v42 = vpack.c.bf16 %v3305_v62, %v3300_v22  ;;  %v3370_v62 = vpack.c.bf16 %v4092_v48, %v4091_v53  ;;  %v4095_v3 = vand.u32 4294901760, %v3061_v52 }
  0x26   :  { %v530_v59 = vand.u32 4294901760, %v2959_v19  ;;  %v537_v17 = vand.u32 4294901760, %v2964_v20  ;;  %v3389_v48 = vpack.c.bf16 %v4097_v46, %v4096_v45  ;;  %v419_v51 = vsub.f32 %v2969_v21, %v418_v55 }
  0x27   :  { %4093 = vst [vmem:[#allocation19_spill] sm:$0xff] %v3370_v62  ;;  %2424 = vmatpush3.bf16.xpose.msra.mxu1 %v3334_v54  ;;  %v3377_v28 = vpack.c.bf16 %v4095_v3, %v4094_v31  ;;  %v426_v31 = vsub.f32 %v2975_v23, %v425_v27  ;;  %v3393_v52 = vpack.c.bf16 %v425_v27, %v418_v55  ;;  %v4098_v53 = vand.u32 4294901760, %v3086_v1 }
  0x28   :  { %2426 = vmatprep.subr.bf16.mxu1 %v3344_v40  ;;  %v4099_v3 = vand.u32 4294901760, %v3112_v14  ;;  %v330_v56 = vsub.f32 %v3294_v58, %v3380_v38  ;;  %v531_v57 = vsub.f32 %v2959_v19, %v530_v59  ;;  %v538_v45 = vsub.f32 %v2964_v20, %v537_v17 }
  0x29   :  { %v420_v21 = vand.u32 4294901760, %v419_v51  ;;  %v427_v46 = vand.u32 4294901760, %v426_v31  ;;  %v3405_v23 = vpack.c.bf16 %v537_v17, %v530_v59  ;;  %v544_v27 = vand.u32 4294901760, %v2993_v30 }
  0x2a   :  { %2500 = vmatpush3.bf16.xpose.msra.mxu0 %v2499_v2  ;;  %v3399_v16 = vpack.c.bf16 %v4099_v3, %v4098_v53  ;;  %v3408_v55 = vand.u32 4294901760, %v330_v56  ;;  %v532_v1 = vand.u32 4294901760, %v531_v57  ;;  %v539_v14 = vand.u32 4294901760, %v538_v45 }
  0x2b   :  { %2502 = vmatprep.subr.bf16.mxu0 %v2501_v18  ;;  %v551_v2 = vand.u32 4294901760, %v3001_v33  ;;  %v3411_v53 = vpack.c.bf16 %v427_v46, %v420_v21  ;;  %v545_v3 = vsub.f32 %v2993_v30, %v544_v27  ;;  %v432_v19 = vand.u32 4294901760, %v3012_v36 }
  0x2c   :  { %v439_v20 = vand.u32 4294901760, %v3017_v37  ;;  %2161 = vmatprep.mubr.f32.mxu1 %v3408_v55  ;;  %v3417_v17 = vpack.c.bf16 %v539_v14, %v532_v1  ;;  %v558_v51 = vand.u32 4294901760, %v3050_v49  ;;  %v565_v46 = vand.u32 4294901760, %v3055_v50 }
  0x2d   :  { %v552_v18 = vsub.f32 %v3001_v33, %v551_v2  ;;  %v3420_v59 = vpack.c.bf16 %v551_v2, %v544_v27  ;;  %v546_v31 = vand.u32 4294901760, %v545_v3  ;;  %v433_v56 = vsub.f32 %v3012_v36, %v432_v19 }
  0x2e   :  { %v440_v57 = vsub.f32 %v3017_v37, %v439_v20  ;;  %v3425_v30 = vpack.c.bf16 %v439_v20, %v432_v19  ;;  %v559_v21 = vsub.f32 %v3050_v49, %v558_v51  ;;  %v446_v33 = vand.u32 4294901760, %v3094_v5 }
  0x2f   :  { %2428 = vmatpush3.bf16.xpose.msra.mxu1 %v3370_v62  ;;  %v553_v45 = vand.u32 4294901760, %v552_v18  ;;  %v434_v27 = vand.u32 4294901760, %v433_v56  ;;  %v453_v14 = vand.u32 4294901760, %v3099_v7  ;;  %v572_v36 = vand.u32 4294901760, %v3104_v8 }
  0x30   :  { %4100 = vst [vmem:[#allocation20_spill] sm:$0xff] %v3425_v30  ;;  %2430 = vmatprep.subr.bf16.mxu1 %v3377_v28  ;;  %v441_v1 = vand.u32 4294901760, %v440_v57  ;;  %v560_v2 = vand.u32 4294901760, %v559_v21  ;;  %v566_v3 = vsub.f32 %v3055_v50, %v565_v46  ;;  %v447_v49 = vsub.f32 %v3094_v5, %v446_v33 }
  0x31   :  { %v3434_v37 = vpack.c.bf16 %v553_v45, %v546_v31  ;;  %v454_v20 = vsub.f32 %v3099_v7, %v453_v14  ;;  %v3441_v18 = vpack.c.bf16 %v565_v46, %v558_v51  ;;  %v3443_v56 = vpack.c.bf16 %v453_v14, %v446_v33 }
  0x32   :  { %2504 = vmatpush3.bf16.xpose.msra.mxu0 %v2503_v25  ;;  %v3438_v19 = vpack.c.bf16 %v441_v1, %v434_v27  ;;  %v567_v57 = vand.u32 4294901760, %v566_v3  ;;  %v448_v30 = vand.u32 4294901760, %v447_v49  ;;  %v573_v25 = vsub.f32 %v3104_v8, %v572_v36 }
  0x33   :  { %2506 = vmatprep.subr.bf16.mxu0 %v2505_v42  ;;  %v579_v31 = vand.u32 4294901760, %v3109_v13  ;;  %v455_v45 = vand.u32 4294901760, %v454_v20  ;;  %v460_v50 = vand.u32 4294901760, %v3124_v32  ;;  %v467_v5 = vand.u32 4294901760, %v3129_v34 }
  0x34   :  { %v586_v42 = vand.u32 4294901760, %v3164_v0  ;;  %v3450_v21 = vpack.c.bf16 %v567_v57, %v560_v2  ;;  %v574_v7 = vand.u32 4294901760, %v573_v25  ;;  %v593_v2 = vand.u32 4294901760, %v3193_v43 }
  0x35   :  { %v580_v51 = vsub.f32 %v3109_v13, %v579_v31  ;;  %v3453_v46 = vpack.c.bf16 %v579_v31, %v572_v36  ;;  %v3455_v33 = vpack.c.bf16 %v455_v45, %v448_v30  ;;  %v461_v8 = vsub.f32 %v3124_v32, %v460_v50  ;;  %v22_v45 = vld [vmem:[%s4021_s1 + $0x8] sm:$0xff] }
  0x36   :  { %v468_v27 = vsub.f32 %v3129_v34, %v467_v5  ;;  %v3459_v1 = vpack.c.bf16 %v467_v5, %v460_v50  ;;  %v587_v3 = vsub.f32 %v3164_v0, %v586_v42  ;;  %v474_v49 = vand.u32 4294901760, %v3207_v26 }
  0x37   :  { %2432 = vmatpush3.bf16.xpose.msra.mxu1 %v3389_v48  ;;  %v581_v14 = vand.u32 4294901760, %v580_v51  ;;  %v462_v13 = vand.u32 4294901760, %v461_v8  ;;  %v481_v36 = vand.u32 4294901760, %v3264_v11  ;;  %v4101_v32 = vpack.c.bf16 %v3315_v6, %v3310_v12 }
  0x38   :  { %2434 = vmatprep.subr.bf16.mxu1 %v3399_v16  ;;  %v469_v30 = vand.u32 4294901760, %v468_v27  ;;  %v588_v20 = vand.u32 4294901760, %v587_v3  ;;  %v594_v57 = vsub.f32 %v3193_v43, %v593_v2  ;;  %v475_v0 = vsub.f32 %v3207_v26, %v474_v49 }
  0x39   :  { %v3470_v34 = vpack.c.bf16 %v581_v14, %v574_v7  ;;  %v4102_v25 = vpack.c.bf16 %v3325_v4, %v3320_v9  ;;  %v2511_v31 = vpack.c.bf16 %v3364_v60, %v3359_v39  ;;  %v482_v5 = vsub.f32 %v3264_v11, %v481_v36 }
  0x3a   :  { %2508 = vmatpush3.bf16.xpose.msra.mxu0 %v4101_v32  ;;  %v3482_v50 = vpack.c.bf16 %v469_v30, %v462_v13  ;;  %v3485_v7 = vpack.c.bf16 %v593_v2, %v586_v42  ;;  %v4103_v43 = vand.u32 4294901760, %v3119_v29  ;;  %v4104_v26 = vand.u32 4294901760, %v3141_v47  ;;  %v23_v47 = vld [vmem:[%s4021_s1 + $0x10] sm:$0xff] }
  0x3b   :  { %2510 = vmatprep.subr.bf16.mxu0 %v4102_v25  ;;  %v595_v8 = vand.u32 4294901760, %v594_v57  ;;  %v476_v27 = vand.u32 4294901760, %v475_v0  ;;  %v3493_v14 = vpack.c.bf16 %v481_v36, %v474_v49  ;;  %v4105_v3 = vand.u32 4294901760, %v3167_v63 }
  0x3c   :  { %v3491_v51 = vpack.c.bf16 %v4104_v26, %v4103_v43  ;;  %v4106_v32 = vand.u32 4294901760, %v3170_v61  ;;  %v483_v30 = vand.u32 4294901760, %v482_v5  ;;  %v600_v11 = vand.u32 4294901760, %v3269_v15 }
  0x3d   :  { %v607_v42 = vand.u32 4294901760, %v3281_v41  ;;  %v114_v29 = vsel %vm109_vm0, %v22_v45, 0  ;;  %v3507_v2 = vpack.c.bf16 %v595_v8, %v588_v20  ;;  %v488_v49 = vand.u32 4294901760, %v3286_v10 }
  0x3e   :  { %v3499_v13 = vpack.c.bf16 %v4106_v32, %v4105_v3  ;;  %v495_v63 = vand.u32 4294901760, %v3291_v24  ;;  %v3511_v61 = vpack.c.bf16 %v483_v30, %v476_v27  ;;  %v601_v36 = vsub.f32 %v3269_v15, %v600_v11 }
  0x3f   :  { %v608_v57 = vsub.f32 %v3281_v41, %v607_v42  ;;  %v3515_v0 = vpack.c.bf16 %v607_v42, %v600_v11  ;;  %2436 = vmatpush3.bf16.xpose.msra.mxu1 %v3491_v51  ;;  %v489_v25 = vsub.f32 %v3286_v10, %v488_v49  ;;  %v117_v20 = vsel %vm109_vm0, %v23_v47, 0  ;;  %v4112_v11 = vld [vmem:[#allocation18_spill] sm:$0xff] }
  0x40   :  { %v496_v45 = vsub.f32 %v3291_v24, %v495_v63  ;;  %2438 = vmatprep.subr.bf16.mxu1 %v3499_v13  ;;  %v602_v5 = vand.u32 4294901760, %v601_v36  ;;  %v3522_v26 = vpack.c.bf16 %v495_v63, %v488_v49  ;;  %v3524_v15 = vand.u32 4294901760, %v114_v29  ;;  %v4110_v24 = vld [vmem:[#allocation5_spill] sm:$0xff]  ;;  %v24_v49 = vld [vmem:[%s4021_s1 + $0x18] sm:$0xff] }
  0x41   :  { %4107 = vst [vmem:[#allocation21_spill] sm:$0xff] %v3515_v0  ;;  %v609_v43 = vand.u32 4294901760, %v608_v57  ;;  %v490_v41 = vand.u32 4294901760, %v489_v25  ;;  %v614_v27 = vand.u32 4294901760, %v3300_v22  ;;  %v4109_v10 = vand.u32 4294901760, %v3179_v44  ;;  %v4113_v57 = vld [vmem:[#allocation6_spill] sm:$0xff] }
  0x42   :  { %4108 = vst [vmem:[#allocation22_spill] sm:$0xff] %v3522_v26  ;;  %2512 = vmatpush3.bf16.xpose.msra.mxu0 %v2511_v31  ;;  %v497_v8 = vand.u32 4294901760, %v496_v45  ;;  %v4111_v3 = vand.u32 4294901760, %v4110_v24  ;;  %v621_v42 = vand.u32 4294901760, %v4112_v11  ;;  %v502_v31 = vand.u32 4294901760, %v3310_v12  ;;  %v4115_v45 = vld [vmem:[#allocation7_spill] sm:$0xff] }
  0x43   :  { %2514 = vmatprep.subr.bf16.mxu0 %v3238_v35  ;;  %v3534_v30 = vpack.c.bf16 %v609_v43, %v602_v5  ;;  %v3538_v47 = vand.u32 4294901760, %v117_v20  ;;  %v615_v44 = vsub.f32 %v3300_v22, %v614_v27  ;;  %v509_v36 = vand.u32 4294901760, %v3315_v6 }
  0x44   :  { %v3532_v32 = vpack.c.bf16 %v4111_v3, %v4109_v10  ;;  %v3543_v63 = vpack.c.bf16 %v497_v8, %v490_v41  ;;  %v4114_v25 = vand.u32 4294901760, %v4113_v57  ;;  %v4116_v5 = vand.u32 4294901760, %v4115_v45 }
  0x45   :  { %v622_v10 = vsub.f32 %v4112_v11, %v621_v42  ;;  %v503_v24 = vsub.f32 %v3310_v12, %v502_v31  ;;  %v3555_v3 = vpack.c.bf16 %v621_v42, %v614_v27  ;;  %v3558_v35 = vsub.f32 %v114_v29, %v3524_v15  ;;  %v25_v12 = vld [vmem:[%s4021_s1 + $0x20] sm:$0xff] }
  0x46   :  { %v3551_v43 = vpack.c.bf16 %v4116_v5, %v4114_v25  ;;  %v616_v41 = vand.u32 4294901760, %v615_v44  ;;  %v510_v22 = vsub.f32 %v3315_v6, %v509_v36  ;;  %v3561_v8 = vpack.c.bf16 %v509_v36, %v502_v31  ;;  %v4119_v44 = vld [vmem:[#allocation13_spill] sm:$0xff] }
  0x47   :  { %4117 = vst [vmem:[#allocation5_spill] sm:$0xff] %v3555_v3  ;;  %v120_v57 = vsel %vm109_vm0, %v24_v49, 0  ;;  %v623_v26 = vand.u32 4294901760, %v622_v10  ;;  %v504_v45 = vand.u32 4294901760, %v503_v24  ;;  %v628_v25 = vand.u32 4294901760, %v3320_v9  ;;  %2440 = vmatpush3.bf16.xpose.msra.mxu1 %v3532_v32  ;;  %v4120_v10 = vld [vmem:[#allocation14_spill] sm:$0xff] }
  0x48   :  { %4118 = vst [vmem:[#allocation18_spill] sm:$0xff] %v3561_v8  ;;  %v511_v27 = vand.u32 4294901760, %v510_v22  ;;  %v635_v29 = vand.u32 4294901760, %v3325_v4  ;;  %v516_v11 = vand.u32 4294901760, %v3359_v39  ;;  %v3573_v6 = vsub.f32 %v117_v20, %v3538_v47  ;;  %2442 = vmatprep.subr.bf16.mxu1 %v3551_v43  ;;  %v4121_v22 = vld [vmem:[#allocation8_spill] sm:$0xff]  ;;  %v4123_v8 = vld [vmem:[#allocation9_spill] sm:$0xff] }
  0x49   :  { %2258 = vmatmul.mubr.f32.vlgmr.msra.gmra.mrb[0].mxu0 %v3294_v58  ;;  %v3576_v42 = vpack.c.bf16 %v623_v26, %v616_v41  ;;  %v629_v31 = vsub.f32 %v3320_v9, %v628_v25  ;;  %v523_v49 = vand.u32 4294901760, %v3364_v60  ;;  %v3582_v36 = vand.u32 4294901760, %v120_v57 }
  0x4a   :  { %2516 = vmatpush3.bf16.xpose.msra.mxu0 %v4119_v44  ;;  %2259 = vmatprep.mubr.f32.mxu0 %v3558_v35  ;;  %v3584_v5 = vpack.c.bf16 %v511_v27, %v504_v45  ;;  %v636_v58 = vsub.f32 %v3325_v4, %v635_v29  ;;  %v517_v20 = vsub.f32 %v3359_v39, %v516_v11  ;;  %v123_v26 = vsel %vm109_vm0, %v25_v12, 0  ;;  %v26_v4 = vld [vmem:[%s4021_s1 + $0x28] sm:$0xff] }
  0x4b   :  { %2518 = vmatprep.subr.bf16.mxu0 %v4120_v10  ;;  %v630_v24 = vand.u32 4294901760, %v629_v31  ;;  %v524_v9 = vsub.f32 %v3364_v60, %v523_v49  ;;  %v3591_v41 = vpack.c.bf16 %v635_v29, %v628_v25  ;;  %v4122_v44 = vand.u32 4294901760, %v4121_v22  ;;  %v4125_v12 = vld [vmem:[#allocation10_spill] sm:$0xff]  ;;  %v4127_v25 = vld [vmem:[#allocation11_spill] sm:$0xff] }
  0x4c   :  { %v4124_v3 = vand.u32 4294901760, %v4123_v8  ;;  %v637_v39 = vand.u32 4294901760, %v636_v58  ;;  %v518_v45 = vand.u32 4294901760, %v517_v20  ;;  %v3602_v27 = vpack.c.bf16 %v523_v49, %v516_v11  ;;  %v27_v58 = vld [vmem:[%s4021_s1 + $0x30] sm:$0xff] }
  0x4d   :  { %2260 = vmatmul.mubr.f32.gmra.mrb[2].mxu0 %v3558_v35  ;;  %v4126_v60 = vand.u32 4294901760, %v4125_v12  ;;  %v4128_v29 = vand.u32 4294901760, %v4127_v25  ;;  %v525_v22 = vand.u32 4294901760, %v524_v9  ;;  %v3613_v8 = vand.u32 4294901760, %v123_v26  ;;  %v4129_v9 = vld [vmem:[#allocation16_spill] sm:$0xff] }
  0x4e   :  { %v3597_v0 = vpack.c.bf16 %v4124_v3, %v4122_v44  ;;  %2261 = vmatprep.mubr.f32.mxu0 %v3573_v6  ;;  %v361_v3 = vsub.f32 %v120_v57, %v3582_v36  ;;  %v3615_v44 = vpack.c.bf16 %v637_v39, %v630_v24  ;;  %v126_v11 = vsel %vm109_vm0, %v26_v4, 0  ;;  %v4131_v39 = vld [vmem:[#allocation17_spill] sm:$0xff] }
  0x4f   :  { %v3609_v31 = vpack.c.bf16 %v4128_v29, %v4126_v60  ;;  %v3618_v49 = vpack.c.bf16 %v525_v22, %v518_v45  ;;  %v372_v57 = vsub.f32 %v123_v26, %v3613_v8  ;;  %v3628_v20 = vand.u32 4294901760, %v126_v11  ;;  %v28_v60 = vld [vmem:[%s4021_s1 + $0x38] sm:$0xff] }
  0x50   :  { %2444 = vmatpush3.bf16.xpose.msra.mxu1 %v3597_v0  ;;  %v129_v24 = vsel %vm109_vm0, %v27_v58, 0  ;;  %v4130_v4 = vand.u32 4294901760, %v4129_v9  ;;  %v4132_v45 = vand.u32 4294901760, %v4131_v39  ;;  %v3642_v25 = vand.u32 4294901760, %v3558_v35 }
  0x51   :  { %2262 = vmatmul.mubr.f32.gmra.mrb[4].mxu0 %v3573_v6  ;;  %2446 = vmatprep.subr.bf16.mxu1 %v3609_v31  ;;  %v383_v26 = vsub.f32 %v126_v11, %v3628_v20  ;;  %v3645_v29 = vand.u32 4294901760, %v129_v24  ;;  %v132_v22 = vsel %vm109_vm0, %v28_v60, 0  ;;  %v3652_v9 = vand.u32 4294901760, %v3573_v6 }
  0x52   :  { %2520 = vmatpush3.bf16.xpose.msra.mxu0 %v3334_v54  ;;  %2263 = vmatprep.mubr.f32.mxu0 %v361_v3  ;;  %v3636_v12 = vpack.c.bf16 %v4132_v45, %v4130_v4  ;;  %v341_v58 = vsub.f32 %v3558_v35, %v3642_v25  ;;  %v3657_v4 = vand.u32 4294901760, %v132_v22  ;;  %v3662_v35 = vand.u32 4294901760, %v361_v3 }
  0x53   :  { %2522 = vmatprep.subr.bf16.mxu0 %v3344_v40  ;;  %v394_v11 = vsub.f32 %v129_v24, %v3645_v29  ;;  %v352_v45 = vsub.f32 %v3573_v6, %v3652_v9 }
  0x54   :  { %v342_v39 = vand.u32 4294901760, %v341_v58  ;;  %v405_v60 = vsub.f32 %v132_v22, %v3657_v4  ;;  %v363_v24 = vsub.f32 %v361_v3, %v3662_v35 }
  0x55   :  { %2264 = vmatmul.mubr.f32.gmra.mrb[6].mxu0 %v361_v3  ;;  %v395_v22 = vand.u32 4294901760, %v394_v11 }
  0x56   :  { %2265 = vmatprep.mubr.f32.mxu0 %v372_v57  ;;  %v364_v6 = vand.u32 4294901760, %v363_v24 }
  0x57   :  { %v396_v58 = vsub.f32 %v394_v11, %v395_v22 }
  0x58   :  { %2448 = vmatpush3.bf16.xpose.msra.mxu1 %v3636_v12 }
  0x59   :  { %2266 = vmatmul.mubr.f32.gmra.mrb[8].mxu0 %v372_v57  ;;  %2450 = vmatprep.subr.bf16.mxu1 %v3417_v17  ;;  %v353_v17 = vand.u32 4294901760, %v352_v45 }
  0x5a   :  { %2524 = vmatpush3.bf16.xpose.msra.mxu0 %v3370_v62  ;;  %2267 = vmatprep.mubr.f32.mxu0 %v383_v26  ;;  %v3668_v62 = vand.u32 4294901760, %v372_v57 }
  0x5b   :  { %2526 = vmatprep.subr.bf16.mxu0 %v3377_v28 }
  0x5d   :  { %2268 = vmatmul.mubr.f32.gmra.mrb[10].mxu0 %v383_v26 }
  0x5e   :  { %2269 = vmatprep.mubr.f32.mxu0 %v394_v11 }
  0x5f   :  { %2162 = vmatmul.mubr.f32.vlgmr.msra.gmra.mrb[0].mxu1 %v3408_v55  ;;  %v374_v55 = vsub.f32 %v372_v57, %v3668_v62 }
  0x60   :  { %2452 = vmatpush3.bf16.xpose.msra.mxu1 %v3411_v53  ;;  %2163 = vmatprep.mubr.f32.mxu1 %v342_v39  ;;  %v3674_v53 = vand.u32 4294901760, %v383_v26 }
  0x61   :  { %2270 = vmatmul.mubr.f32.gmra.mrb[12].mxu0 %v394_v11  ;;  %2454 = vmatprep.subr.bf16.mxu1 %v3434_v37  ;;  %v375_v37 = vand.u32 4294901760, %v374_v55 }
  0x62   :  { %2528 = vmatpush3.bf16.xpose.msra.mxu0 %v3389_v48  ;;  %2271 = vmatprep.mubr.f32.mxu0 %v405_v60  ;;  %v385_v3 = vsub.f32 %v383_v26, %v3674_v53 }
  0x63   :  { %2530 = vmatprep.subr.bf16.mxu0 %v3399_v16  ;;  %2164 = vmatmul.mubr.f32.gmra.mrb[2].mxu1 %v342_v39  ;;  %v406_v39 = vand.u32 4294901760, %v405_v60 }
  0x64   :  { %2165 = vmatprep.mubr.f32.mxu1 %v353_v17  ;;  %v386_v57 = vand.u32 4294901760, %v385_v3 }
  0x65   :  { %2272 = vmatmul.mubr.f32.gmra.mrb[14].mxu0 %v405_v60  ;;  %v407_v45 = vsub.f32 %v405_v60, %v406_v39 }
  0x66   :  { %2305 = vmatprep.mubr.f32.mxu0 %v3380_v38 }
  0x67   :  { %2166 = vmatmul.mubr.f32.gmra.mrb[4].mxu1 %v353_v17 }
  0x68   :  { %2456 = vmatpush3.bf16.xpose.msra.mxu1 %v3438_v19  ;;  %2167 = vmatprep.mubr.f32.mxu1 %v364_v6  ;;  %v397_v19 = vand.u32 4294901760, %v396_v58 }
  0x69   :  { %2458 = vmatprep.subr.bf16.mxu1 %v3450_v21  ;;  %v408_v21 = vand.u32 4294901760, %v407_v45 }
  0x6a   :  { %2532 = vmatpush3.bf16.xpose.msra.mxu0 %v3491_v51 }
  0x6b   :  { %2534 = vmatprep.subr.bf16.mxu0 %v3499_v13  ;;  %2168 = vmatmul.mubr.f32.gmra.mrb[6].mxu1 %v364_v6 }
  0x6c   :  { %2169 = vmatprep.mubr.f32.mxu1 %v375_v37 }
  0x6f   :  { %2170 = vmatmul.mubr.f32.gmra.mrb[8].mxu1 %v375_v37 }
  0x70   :  { %2460 = vmatpush3.bf16.xpose.msra.mxu1 %v3455_v33  ;;  %2171 = vmatprep.mubr.f32.mxu1 %v386_v57  ;;  %v4133_v33 = vld [vmem:[#allocation15_spill] sm:$0xff] }
  0x71   :  { %2462 = vmatprep.subr.bf16.mxu1 %v3470_v34  ;;  %v66_v34 = vld [vmem:[%s4022_s2 + $0x28] sm:$0xff] }
  0x72   :  { %2536 = vmatpush3.bf16.xpose.msra.mxu0 %v3532_v32 }
  0x73   :  { %2538 = vmatprep.subr.bf16.mxu0 %v3551_v43  ;;  %2172 = vmatmul.mubr.f32.gmra.mrb[10].mxu1 %v386_v57 }
  0x74   :  { %2173 = vmatprep.mubr.f32.mxu1 %v397_v19 }
  0x77   :  { %2174 = vmatmul.mubr.f32.gmra.mrb[12].mxu1 %v397_v19 }
  0x78   :  { %2464 = vmatpush3.bf16.xpose.msra.mxu1 %v3482_v50  ;;  %2175 = vmatprep.mubr.f32.mxu1 %v408_v21  ;;  %v1445_v50 = vld [vmem:[%s4024_s4] sm:$0x3] }
  0x79   :  { %2466 = vmatprep.subr.bf16.mxu1 %v3507_v2  ;;  %v4137_v2 = vld [vmem:[#allocation5_spill] sm:$0xff] }
  0x7a   :  { %2540 = vmatpush3.bf16.xpose.msra.mxu0 %v3597_v0 }
  0x7b   :  { %2542 = vmatprep.subr.bf16.mxu0 %v3609_v31  ;;  %2176 = vmatmul.mubr.f32.gmra.mrb[14].mxu1 %v408_v21 }
  0x7c   :  { %2209 = vmatprep.mubr.f32.mxu1 %v4133_v33 }
  0x80   :  { %2468 = vmatpush3.bf16.xpose.msra.mxu1 %v3511_v61  ;;  %v4138_v61 = vld [vmem:[#allocation18_spill] sm:$0xff] }
  0x81   :  { %2470 = vmatprep.subr.bf16.mxu1 %v3534_v30  ;;  %v4139_v30 = vld [vmem:[#allocation12_spill] sm:$0xff] }
  0x82   :  { %2544 = vmatpush3.bf16.xpose.msra.mxu0 %v3636_v12 }
  0x83   :  { %2546 = vmatprep.subr.bf16.mxu0 %v3405_v23  ;;  %v4134_v23 = vld [vmem:[#allocation20_spill] sm:$0xff] }
  0x88   :  { %2472 = vmatpush3.bf16.xpose.msra.mxu1 %v3543_v63  ;;  %v4140_v63 = vld [vmem:[#allocation13_spill] sm:$0xff] }
  0x89   :  { %2306 = vmatmul.mubr.f32.vlgmr.msra.gmra.mrb[0].mxu0 %v3380_v38  ;;  %2474 = vmatprep.subr.bf16.mxu1 %v3576_v42  ;;  %v61_v38 = vld [vmem:[%s4022_s2] sm:$0xff]  ;;  %v4141_v42 = vld [vmem:[#allocation19_spill] sm:$0xff] }
  0x8a   :  { %2548 = vmatpush3.bf16.xpose.msra.mxu0 %v3393_v52  ;;  %2307 = vmatprep.mubr.f32.mxu0 %v3642_v25  ;;  %v2874_v52 = vmov 0  }
  0x8b   :  { %2550 = vmatprep.subr.bf16.mxu0 %v3420_v59  ;;  %2816 = vset.pattern.permute.xlu0 %v2874_v52  ;;  %v63_v59 = vld [vmem:[%s4022_s2 + $0x10] sm:$0xff] }
  0x8c   :  { %71 = vperm.xlu0 %2816, %v61_v38   ;;  %2817 = vset.pattern.permute.xlu1 %v2874_v52 }
  0x8d   :  { %2308 = vmatmul.mubr.f32.gmra.mrb[2].mxu0 %v3642_v25  ;;  %81 = vperm.xlu1 %2817, %v63_v59  }
  0x8e   :  { %2309 = vmatprep.mubr.f32.mxu0 %v3652_v9 }
  0x90   :  { %2476 = vmatpush3.bf16.xpose.msra.mxu1 %v3584_v5 }
  0x91   :  { %2310 = vmatmul.mubr.f32.gmra.mrb[4].mxu0 %v3652_v9  ;;  %2478 = vmatprep.subr.bf16.mxu1 %v3615_v44  ;;  %v1444_v9 = vld [vmem:[%s4023_s3] sm:$0x3]  ;;  %s2876_s3 = smov [#allocation2]  }
  0x92   :  { %2552 = vmatpush3.bf16.xpose.msra.mxu0 %v4134_v23  ;;  %2311 = vmatprep.mubr.f32.mxu0 %v3662_v35  ;;  %v1453_v24 = vsel %vm1451_vm1, %v1444_v9, 0  ;;  %s2120_s13 = sshll.u32 %s2876_s3, 4  ;;  %s2121_s13 = int_to_ptr.vmem [resolvable:$true] %s2120_s13 }
  0x93   :  { %2554 = vmatprep.subr.bf16.mxu0 %v3441_v18  ;;  %v65_v18 = vld [vmem:[%s4022_s2 + $0x20] sm:$0xff]  ;;  %s2850_s14 = scalar_lea.vmem %s2121_s13, 64  ;;  %p2855_p1 = scmp.lt.s32.totalorder %s2121_s13, %s2121_s13 }
  0x94   :  { %p2851_p0 = scmp.ne.s32.totalorder %s2121_s13, %s2850_s14  ;;  %p2856_p2 = scmp.lt.s32.totalorder %s2850_s14, %s2850_s14 }
  0x95   :  { %2312 = vmatmul.mubr.f32.gmra.mrb[6].mxu0 %v3662_v35 }
  0x96   :  { %2313 = vmatprep.mubr.f32.mxu0 %v3668_v62  ;;  %p2857_p3 = por %p2856_p2, %p2855_p1 }
  0x98   :  { %2480 = vmatpush3.bf16.xpose.msra.mxu1 %v3618_v49  ;;  %p2858_p4 = pnand %p2857_p3, %p2851_p0 }
  0x99   :  { %2314 = vmatmul.mubr.f32.gmra.mrb[8].mxu0 %v3668_v62  ;;  %v62_v62 = vld [vmem:[%s4022_s2 + $0x8] sm:$0xff] }
  0x9a   :  { %2556 = vmatpush3.bf16.xpose.msra.mxu0 %v3443_v56  ;;  %2315 = vmatprep.mubr.f32.mxu0 %v3674_v53  ;;  %v64_v56 = vld [vmem:[%s4022_s2 + $0x18] sm:$0xff] }
  0x9b   :  { %2558 = vmatprep.subr.bf16.mxu0 %v3453_v46  ;;  %76 = vperm.xlu0 %2816, %v62_v62   ;;  %v4135_v46 = vld [vmem:[#allocation21_spill] sm:$0xff] }
  0x9c   :  { %86 = vperm.xlu1 %2817, %v64_v56  }
  0x9d   :  { %2316 = vmatmul.mubr.f32.gmra.mrb[10].mxu0 %v3674_v53 }
  0x9e   :  { %2317 = vmatprep.mubr.f32.mxu0 %v395_v22 }
  0x9f   :  { %2210 = vmatmul.mubr.f32.vlgmr.msra.gmra.mrb[0].mxu1 %v4133_v33  ;;  %91 = vperm.xlu0 %2816, %v65_v18  }
  0xa0   :  { %2211 = vmatprep.mubr.f32.mxu1 %v3524_v15  ;;  %96 = vperm.xlu1 %2817, %v66_v34  }
  0xa1   :  { %2318 = vmatmul.mubr.f32.gmra.mrb[12].mxu0 %v395_v22  ;;  %v3828_v22 = vand.u32 4294901760, %v1453_v24 }
  0xa2   :  { %2560 = vmatpush3.bf16.xpose.msra.mxu0 %v3459_v1  ;;  %2319 = vmatprep.mubr.f32.mxu0 %v406_v39  ;;  %v67_v1 = vld [vmem:[%s4022_s2 + $0x30] sm:$0xff] }
  0xa3   :  { %2562 = vmatprep.subr.bf16.mxu0 %v3485_v7  ;;  %2212 = vmatmul.mubr.f32.gmra.mrb[2].mxu1 %v3524_v15  ;;  %v68_v7 = vld [vmem:[%s4022_s2 + $0x38] sm:$0xff]  ;;  %v3831_v38 = vsub.f32 %v1453_v24, %v3828_v22 }
  0xa4   :  { %2213 = vmatprep.mubr.f32.mxu1 %v3538_v47  ;;  %101 = vperm.xlu0 %2816, %v67_v1  }
  0xa5   :  { %2320 = vmatmul.mubr.f32.gmra.mrb[14].mxu0 %v406_v39  ;;  %106 = vperm.xlu1 %2817, %v68_v7  }
  0xa6   :  { %2353 = vmatprep.mubr.f32.mxu0 %v4133_v33 }
  0xa7   :  { %2214 = vmatmul.mubr.f32.gmra.mrb[4].mxu1 %v3538_v47 }
  0xa8   :  { %2215 = vmatprep.mubr.f32.mxu1 %v3582_v36  ;;  %1448 = vperm.xlu0 %2816, %v1445_v50  }
  0xaa   :  { %2564 = vmatpush3.bf16.xpose.msra.mxu0 %v3493_v14  ;;  %v4136_v14 = vld [vmem:[#allocation22_spill] sm:$0xff] }
  0xab   :  { %2566 = vmatprep.subr.bf16.mxu0 %v4135_v46  ;;  %2216 = vmatmul.mubr.f32.gmra.mrb[6].mxu1 %v3582_v36 }
  0xac   :  { %2217 = vmatprep.mubr.f32.mxu1 %v3613_v8 }
  0xaf   :  { %2218 = vmatmul.mubr.f32.gmra.mrb[8].mxu1 %v3613_v8 }
  0xb0   :  { %2219 = vmatprep.mubr.f32.mxu1 %v3628_v20 }
  0xb2   :  { %2568 = vmatpush3.bf16.xpose.msra.mxu0 %v4136_v14 }
  0xb3   :  { %2570 = vmatprep.subr.bf16.mxu0 %v4137_v2  ;;  %2220 = vmatmul.mubr.f32.gmra.mrb[10].mxu1 %v3628_v20 }
  0xb4   :  { %2221 = vmatprep.mubr.f32.mxu1 %v3645_v29 }
  0xb7   :  { %2222 = vmatmul.mubr.f32.gmra.mrb[12].mxu1 %v3645_v29 }
  0xb8   :  { %2223 = vmatprep.mubr.f32.mxu1 %v3657_v4 }
  0xba   :  { %2572 = vmatpush3.bf16.xpose.msra.mxu0 %v4138_v61 }
  0xbb   :  { %2574 = vmatprep.subr.bf16.mxu0 %v3591_v41  ;;  %2224 = vmatmul.mubr.f32.gmra.mrb[14].mxu1 %v3657_v4  ;;  %v2875_v41 = vmov 0.0  }
  0xbc   :  { %1535 = vmatprep.mubr.f32.mxu1 %v2875_v41 }
  0xc2   :  { %2576 = vmatpush3.bf16.xpose.msra.mxu0 %v3602_v27 }
  0xc3   :  { %2578 = vmatprep.subr.bf16.mxu0 %v4139_v30 }
  0xc9   :  { %2354 = vmatmul.mubr.f32.vlgmr.msra.gmra.mrb[0].mxu0 %v4133_v33 }
  0xca   :  { %2580 = vmatpush3.bf16.xpose.msra.mxu0 %v4140_v63  ;;  %2355 = vmatprep.mubr.f32.mxu0 %v3524_v15 }
  0xcb   :  { %2582 = vmatprep.subr.bf16.mxu0 %v4120_v10 }
  0xcd   :  { %2356 = vmatmul.mubr.f32.gmra.mrb[2].mxu0 %v3524_v15 }
  0xce   :  { %2357 = vmatprep.mubr.f32.mxu0 %v3538_v47 }
  0xd1   :  { %2358 = vmatmul.mubr.f32.gmra.mrb[4].mxu0 %v3538_v47 }
  0xd2   :  { %2584 = vmatpush3.bf16.xpose.msra.mxu0 %v3334_v54  ;;  %2359 = vmatprep.mubr.f32.mxu0 %v3582_v36 }
  0xd3   :  { %2586 = vmatprep.subr.bf16.mxu0 %v3344_v40 }
  0xd5   :  { %2360 = vmatmul.mubr.f32.gmra.mrb[6].mxu0 %v3582_v36 }
  0xd6   :  { %2361 = vmatprep.mubr.f32.mxu0 %v3613_v8 }
  0xd9   :  { %2362 = vmatmul.mubr.f32.gmra.mrb[8].mxu0 %v3613_v8 }
  0xda   :  { %2588 = vmatpush3.bf16.xpose.msra.mxu0 %v4141_v42  ;;  %2363 = vmatprep.mubr.f32.mxu0 %v3628_v20  ;;  %v1538_v42 = vand.u32 4294901760, %v3831_v38 }
  0xdb   :  { %2590 = vmatprep.subr.bf16.mxu0 %v3377_v28 }
  0xdd   :  { %2364 = vmatmul.mubr.f32.gmra.mrb[10].mxu0 %v3628_v20 }
  0xde   :  { %2365 = vmatprep.mubr.f32.mxu0 %v3645_v29 }
  0xe1   :  { %2366 = vmatmul.mubr.f32.gmra.mrb[12].mxu0 %v3645_v29 }
  0xe2   :  { %2592 = vmatpush3.bf16.xpose.msra.mxu0 %v3389_v48  ;;  %2367 = vmatprep.mubr.f32.mxu0 %v3657_v4 }
  0xe3   :  { %2594 = vmatprep.subr.bf16.mxu0 %v3399_v16 }
  0xe5   :  { %2368 = vmatmul.mubr.f32.gmra.mrb[14].mxu0 %v3657_v4 }
  0xe6   :  { %2401 = vmatprep.mubr.f32.mxu0 %v4133_v33 }
  0xea   :  { %2596 = vmatpush3.bf16.xpose.msra.mxu0 %v3491_v51 }
  0xeb   :  { %2598 = vmatprep.subr.bf16.mxu0 %v3499_v13 }
  0xf2   :  { %2600 = vmatpush3.bf16.xpose.msra.mxu0 %v3532_v32 }
  0xf3   :  { %2602 = vmatprep.subr.bf16.mxu0 %v3551_v43 }
  0xfa   :  { %2604 = vmatpush3.bf16.xpose.msra.mxu0 %v3597_v0 }
  0xfb   :  { %2606 = vmatprep.subr.bf16.mxu0 %v3609_v31 }
 0x102   :  { %2608 = vmatpush3.bf16.xpose.msra.mxu0 %v3636_v12 }
 0x109   :  { %2402 = vmatmul.mubr.f32.vlgmr.msra.gmra.mrb[0].mxu0 %v4133_v33 }
 0x10a   :  { %2403 = vmatprep.mubr.f32.mxu0 %v3524_v15 }
 0x10b   :  { %v72_v31 = vpop.permute.xlu0 %71 }
 0x10c   :  { %v82_v12 = vpop.permute.xlu1 %81 }
 0x10d   :  { %2404 = vmatmul.mubr.f32.gmra.mrb[2].mxu0 %v3524_v15 }
 0x10e   :  { %2405 = vmatprep.mubr.f32.mxu0 %v3538_v47 }
 0x111   :  { %2406 = vmatmul.mubr.f32.gmra.mrb[4].mxu0 %v3538_v47 }
 0x112   :  { %2407 = vmatprep.mubr.f32.mxu0 %v3582_v36 }
 0x115   :  { %2408 = vmatmul.mubr.f32.gmra.mrb[6].mxu0 %v3582_v36 }
 0x116   :  { %2409 = vmatprep.mubr.f32.mxu0 %v3613_v8 }
 0x119   :  { %2410 = vmatmul.mubr.f32.gmra.mrb[8].mxu0 %v3613_v8 }
 0x11a   :  { %2411 = vmatprep.mubr.f32.mxu0 %v3628_v20  ;;  %v77_v49 = vpop.permute.xlu0 %76 }
 0x11b   :  { %v87_v53 = vpop.permute.xlu1 %86 }
 0x11d   :  { %2412 = vmatmul.mubr.f32.gmra.mrb[10].mxu0 %v3628_v20 }
 0x11e   :  { %2413 = vmatprep.mubr.f32.mxu0 %v3645_v29  ;;  %v92_v39 = vpop.permute.xlu0 %91 }
 0x11f   :  { %v97_v21 = vpop.permute.xlu1 %96 }
 0x121   :  { %2414 = vmatmul.mubr.f32.gmra.mrb[12].mxu0 %v3645_v29 }
 0x122   :  { %2415 = vmatprep.mubr.f32.mxu0 %v3657_v4 }
 0x123   :  { %v102_v46 = vpop.permute.xlu0 %101 }
 0x124   :  { %v107_v14 = vpop.permute.xlu1 %106 }
 0x125   :  { %2416 = vmatmul.mubr.f32.gmra.mrb[14].mxu0 %v3657_v4 }
 0x172   :  { %v642_v54 = vpop.f32.mrb[0].mxu1 }
 0x173   :  { %v644_v28 = vpop.f32.mrb[1].mxu1  ;;  %v2705_v8 = vadd.f32 %v642_v54, %v72_v31 }
 0x174   :  { %v2707_v44 = vadd.f32 %v644_v28, %v72_v31 }
 0x176   :  { %v649_v16 = vpop.f32.mrb[2].mxu1 }
 0x177   :  { %v651_v40 = vpop.f32.mrb[3].mxu1  ;;  %v2709_v11 = vadd.f32 %v649_v16, %v77_v49 }
 0x178   :  { %v2711_v4 = vadd.f32 %v651_v40, %v77_v49 }
 0x17a   :  { %v656_v48 = vpop.f32.mrb[4].mxu1 }
 0x17b   :  { %v658_v51 = vpop.f32.mrb[5].mxu1  ;;  %v2713_v55 = vadd.f32 %v656_v48, %v82_v12 }
 0x17c   :  { %v2715_v37 = vadd.f32 %v658_v51, %v82_v12 }
 0x17e   :  { %v663_v13 = vpop.f32.mrb[6].mxu1 }
 0x17f   :  { %v665_v0 = vpop.f32.mrb[7].mxu1  ;;  %v2717_v45 = vadd.f32 %v663_v13, %v87_v53 }
 0x180   :  { %v2719_v33 = vadd.f32 %v665_v0, %v87_v53 }
 0x182   :  { %v670_v15 = vpop.f32.mrb[8].mxu1 }
 0x183   :  { %v672_v32 = vpop.f32.mrb[9].mxu1  ;;  %v2721_v56 = vadd.f32 %v670_v15, %v92_v39 }
 0x184   :  { %v2723_v50 = vadd.f32 %v672_v32, %v92_v39 }
 0x186   :  { %v677_v47 = vpop.f32.mrb[10].mxu1 }
 0x187   :  { %v679_v43 = vpop.f32.mrb[11].mxu1  ;;  %v2725_v7 = vadd.f32 %v677_v47, %v97_v21 }
 0x188   :  { %v2727_v61 = vadd.f32 %v679_v43, %v97_v21 }
 0x18a   :  { %v3816_v36 = vpop.f32.mrb[12].mxu1 }
 0x18b   :  { %v3818_v5 = vpop.f32.mrb[13].mxu1  ;;  %v2729_v28 = vadd.f32 %v3816_v36, %v102_v46 }
 0x18c   :  { %v2731_v16 = vadd.f32 %v3818_v5, %v102_v46 }
 0x18e   :  { %v3820_v10 = vpop.f32.mrb[14].mxu1 }
 0x18f   :  { %v3823_v27 = vpop.f32.mrb[15].mxu1  ;;  %v2733_v0 = vadd.f32 %v3820_v10, %v107_v14 }
 0x190   :  { %v2735_v43 = vadd.f32 %v3823_v27, %v107_v14 }
 0x1dc   :  { %v1374_v20 = vpop.f32.mrb[0].mxu0 }
 0x1dd   :  { %v2706_v25 = vadd.f32 %v2705_v8, %v1374_v20  ;;  %v1376_v26 = vpop.f32.mrb[1].mxu0 }
 0x1de   :  { %v2708_v29 = vadd.f32 %v2707_v44, %v1376_v26 }
 0x1df   :  { %2818 = vtanh.f32 %v2706_v25 }
 0x1e0   :  { %2820 = vtanh.f32 %v2708_v29  ;;  %v1381_v35 = vpop.f32.mrb[2].mxu0 }
 0x1e1   :  { %v2710_v60 = vadd.f32 %v2709_v11, %v1381_v35  ;;  %v1383_v17 = vpop.f32.mrb[3].mxu0 }
 0x1e2   :  { %v2712_v6 = vadd.f32 %v2711_v4, %v1383_v17 }
 0x1e3   :  { %2822 = vtanh.f32 %v2710_v60 }
 0x1e4   :  { %2824 = vtanh.f32 %v2712_v6  ;;  %v1388_v3 = vpop.f32.mrb[4].mxu0 }
 0x1e5   :  { %v2714_v57 = vadd.f32 %v2713_v55, %v1388_v3  ;;  %v1390_v58 = vpop.f32.mrb[5].mxu0 }
 0x1e6   :  { %v2716_v19 = vadd.f32 %v2715_v37, %v1390_v58 }
 0x1e7   :  { %2826 = vtanh.f32 %v2714_v57 }
 0x1e8   :  { %2828 = vtanh.f32 %v2716_v19  ;;  %v1395_v23 = vpop.f32.mrb[6].mxu0 }
 0x1e9   :  { %v2819_v52 = vpop.eup %2818  ;;  %v2718_v62 = vadd.f32 %v2717_v45, %v1395_v23  ;;  %v1397_v59 = vpop.f32.mrb[7].mxu0 }
 0x1ea   :  { %v2821_v18 = vpop.eup %2820  ;;  %v2720_v1 = vadd.f32 %v2719_v33, %v1397_v59  ;;  %v1457_v34 = vand.u32 4294901760, %v2819_v52 }
 0x1eb   :  { %2830 = vtanh.f32 %v2718_v62  ;;  %v1455_v2 = vand.u32 4294901760, %v2821_v18 }
 0x1ec   :  { %2832 = vtanh.f32 %v2720_v1  ;;  %v1402_v30 = vpop.f32.mrb[8].mxu0  ;;  %v3833_v63 = vsub.f32 %v2819_v52, %v1457_v34 }
 0x1ed   :  { %v2823_v54 = vpop.eup %2822  ;;  %v2722_v40 = vadd.f32 %v2721_v56, %v1402_v30  ;;  %v1404_v48 = vpop.f32.mrb[9].mxu0  ;;  %v3838_v51 = vsub.f32 %v2821_v18, %v1455_v2 }
 0x1ee   :  { %v2825_v13 = vpop.eup %2824  ;;  %v2724_v15 = vadd.f32 %v2723_v50, %v1404_v48  ;;  %v1461_v32 = vand.u32 4294901760, %v2823_v54  ;;  %v1555_v47 = vand.u32 4294901760, %v3833_v63 }
 0x1ef   :  { %2834 = vtanh.f32 %v2722_v40  ;;  %v1459_v31 = vand.u32 4294901760, %v2825_v13  ;;  %v1549_v8 = vand.u32 4294901760, %v3838_v51 }
 0x1f0   :  { %2836 = vtanh.f32 %v2724_v15  ;;  %v1409_v36 = vpop.f32.mrb[10].mxu0  ;;  %v3844_v5 = vpack.c.bf16 %v1461_v32, %v1457_v34  ;;  %v3846_v44 = vsub.f32 %v2823_v54, %v1461_v32  ;;  %v1556_v10 = vsub.f32 %v3833_v63, %v1555_v47 }
 0x1f1   :  { %v2827_v49 = vpop.eup %2826  ;;  %v2726_v20 = vadd.f32 %v2725_v7, %v1409_v36  ;;  %v1411_v12 = vpop.f32.mrb[11].mxu0  ;;  %v3851_v25 = vpack.c.bf16 %v1459_v31, %v1455_v2  ;;  %v3853_v27 = vsub.f32 %v2825_v13, %v1459_v31  ;;  %v1550_v26 = vsub.f32 %v3838_v51, %v1549_v8 }
 0x1f2   :  { %v2829_v29 = vpop.eup %2828  ;;  %v2728_v9 = vadd.f32 %v2727_v61, %v1411_v12  ;;  %v1465_v11 = vand.u32 4294901760, %v2827_v49  ;;  %v1557_v4 = vand.u32 4294901760, %v1556_v10  ;;  %v1567_v35 = vand.u32 4294901760, %v3846_v44 }
 0x1f3   :  { %2838 = vtanh.f32 %v2726_v20  ;;  %2610 = vmatprep.subr.bf16.mxu1 %v3851_v25  ;;  %v1463_v60 = vand.u32 4294901760, %v2829_v29  ;;  %v1551_v17 = vand.u32 4294901760, %v1550_v26  ;;  %v1561_v24 = vand.u32 4294901760, %v3853_v27 }
 0x1f4   :  { %2840 = vtanh.f32 %v2728_v9  ;;  %v1416_v6 = vpop.f32.mrb[12].mxu0  ;;  %2612 = vmatpush1.bf16.msra.mxu1 %v3844_v5  ;;  %v3862_v55 = vsub.f32 %v2827_v49, %v1465_v11  ;;  %v1568_v53 = vsub.f32 %v3846_v44, %v1567_v35  ;;  %v2641_v37 = vpack.c.bf16 %v3853_v27, %v3838_v51 }
 0x1f5   :  { %v2831_v3 = vpop.eup %2830  ;;  %v2730_v57 = vadd.f32 %v2729_v28, %v1416_v6  ;;  %v1418_v58 = vpop.f32.mrb[13].mxu0  ;;  %v3869_v39 = vsub.f32 %v2829_v29, %v1463_v60  ;;  %v1562_v19 = vsub.f32 %v3853_v27, %v1561_v24  ;;  %v2643_v45 = vpack.c.bf16 %v3846_v44, %v3833_v63 }
 0x1f6   :  { %v2833_v21 = vpop.eup %2832  ;;  %v2732_v33 = vadd.f32 %v2731_v16, %v1418_v58  ;;  %v1469_v23 = vand.u32 4294901760, %v2831_v3  ;;  %v1569_v52 = vand.u32 4294901760, %v1568_v53  ;;  %v1579_v62 = vand.u32 4294901760, %v3862_v55 }
 0x1f7   :  { %2842 = vtanh.f32 %v2730_v57  ;;  %v1467_v59 = vand.u32 4294901760, %v2833_v21  ;;  %v1563_v18 = vand.u32 4294901760, %v1562_v19  ;;  %v1573_v56 = vand.u32 4294901760, %v3869_v39 }
 0x1f8   :  { %2844 = vtanh.f32 %v2732_v33  ;;  %v1423_v46 = vpop.f32.mrb[14].mxu0  ;;  %v3876_v1 = vpack.c.bf16 %v1469_v23, %v1465_v11  ;;  %v3878_v34 = vsub.f32 %v2831_v3, %v1469_v23  ;;  %v3880_v50 = vpack.c.bf16 %v1569_v52, %v1557_v4 }
 0x1f9   :  { %v2835_v7 = vpop.eup %2834  ;;  %v2734_v14 = vadd.f32 %v2733_v0, %v1423_v46  ;;  %v1425_v2 = vpop.f32.mrb[15].mxu0  ;;  %v3882_v61 = vpack.c.bf16 %v1467_v59, %v1463_v60  ;;  %v3884_v30 = vsub.f32 %v2833_v21, %v1467_v59  ;;  %v3886_v54 = vpack.c.bf16 %v1563_v18, %v1551_v17 }
 0x1fa   :  { %v2837_v28 = vpop.eup %2836  ;;  %v2736_v16 = vadd.f32 %v2735_v43, %v1425_v2  ;;  %v1473_v40 = vand.u32 4294901760, %v2835_v7  ;;  %v1574_v48 = vsub.f32 %v3869_v39, %v1573_v56  ;;  %v1580_v13 = vsub.f32 %v3862_v55, %v1579_v62 }
 0x1fb   :  { %2846 = vtanh.f32 %v2734_v14  ;;  %2614 = vmatprep.subr.bf16.mxu1 %v3882_v61  ;;  %v1471_v0 = vand.u32 4294901760, %v2837_v28  ;;  %v1585_v15 = vand.u32 4294901760, %v3884_v30  ;;  %v1591_v32 = vand.u32 4294901760, %v3878_v34 }
 0x1fc   :  { %2848 = vtanh.f32 %v2736_v16  ;;  %2616 = vmatpush1.bf16.msra.mxu1 %v3876_v1  ;;  %v3898_v43 = vsub.f32 %v2835_v7, %v1473_v40  ;;  %v1575_v31 = vand.u32 4294901760, %v1574_v48  ;;  %v1581_v36 = vand.u32 4294901760, %v1580_v13 }
 0x1fd   :  { %v2839_v10 = vpop.eup %2838  ;;  %v3900_v49 = vsub.f32 %v2837_v28, %v1471_v0  ;;  %v1586_v20 = vsub.f32 %v3884_v30, %v1585_v15  ;;  %v1592_v12 = vsub.f32 %v3878_v34, %v1591_v32  ;;  %v2645_v26 = vpack.c.bf16 %v3884_v30, %v3869_v39 }
 0x1fe   :  { %v2841_v29 = vpop.eup %2840  ;;  %v1477_v9 = vand.u32 4294901760, %v2839_v10  ;;  %v1603_v11 = vand.u32 4294901760, %v3898_v43  ;;  %v2647_v4 = vpack.c.bf16 %v3878_v34, %v3862_v55  ;;  %v3911_v60 = vpack.c.bf16 %v1561_v24, %v1549_v8 }
 0x1ff   :  { %v1475_v17 = vand.u32 4294901760, %v2841_v29  ;;  %v1587_v6 = vand.u32 4294901760, %v1586_v20  ;;  %v1593_v53 = vand.u32 4294901760, %v1592_v12  ;;  %v1597_v3 = vand.u32 4294901760, %v3900_v49 }
 0x200   :  { %v3914_v57 = vpack.c.bf16 %v1477_v9, %v1473_v40  ;;  %v3916_v58 = vsub.f32 %v2839_v10, %v1477_v9  ;;  %v1604_v19 = vsub.f32 %v3898_v43, %v1603_v11  ;;  %v3923_v21 = vpack.c.bf16 %v1567_v35, %v1555_v47 }
 0x201   :  { %v2843_v33 = vpop.eup %2842  ;;  %v3925_v8 = vpack.c.bf16 %v1475_v17, %v1471_v0  ;;  %v3927_v24 = vsub.f32 %v2841_v29, %v1475_v17  ;;  %v2629_v23 = vpack.c.bf16 %v1587_v6, %v1575_v31  ;;  %v2631_v52 = vpack.c.bf16 %v1593_v53, %v1581_v36 }
 0x202   :  { %v2845_v59 = vpop.eup %2844  ;;  %v1481_v18 = vand.u32 4294901760, %v2843_v33  ;;  %v1539_v46 = vsub.f32 %v3831_v38, %v1538_v42  ;;  %v1598_v7 = vsub.f32 %v3900_v49, %v1597_v3  ;;  %v1615_v14 = vand.u32 4294901760, %v3916_v58 }
 0x203   :  { %2618 = vmatprep.subr.bf16.mxu1 %v3925_v8  ;;  %v1479_v47 = vand.u32 4294901760, %v2845_v59  ;;  %v1609_v35 = vand.u32 4294901760, %v3927_v24  ;;  %v2649_v2 = vpack.c.bf16 %v3927_v24, %v3900_v49  ;;  %v2651_v28 = vpack.c.bf16 %v3916_v58, %v3898_v43 }
 0x204   :  { %2620 = vmatpush1.bf16.msra.mxu1 %v3914_v57  ;;  %v1626_v16 = vsub.f32 %v2843_v33, %v1481_v18  ;;  %v1605_v40 = vand.u32 4294901760, %v1604_v19  ;;  %v1616_v48 = vsub.f32 %v3916_v58, %v1615_v14  ;;  %v3944_v13 = vpack.c.bf16 %v1585_v15, %v1573_v56 }
 0x205   :  { %v2847_v0 = vpop.eup %2846  ;;  %v1620_v31 = vsub.f32 %v2845_v59, %v1479_v47  ;;  %v1610_v36 = vsub.f32 %v3927_v24, %v1609_v35  ;;  %v3949_v10 = vpack.c.bf16 %v1591_v32, %v1579_v62  ;;  %v3951_v49 = vpack.c.bf16 %v1609_v35, %v1597_v3 }
 0x206   :  { %v2849_v43 = vpop.eup %2848  ;;  %v1485_v20 = vand.u32 4294901760, %v2847_v0  ;;  %v1617_v12 = vand.u32 4294901760, %v1616_v48  ;;  %v1627_v29 = vand.u32 4294901760, %v1626_v16  ;;  %v3953_v9 = vpack.c.bf16 %v1615_v14, %v1603_v11 }
 0x207   :  { %v1483_v17 = vand.u32 4294901760, %v2849_v43  ;;  %v1599_v6 = vand.u32 4294901760, %v1598_v7  ;;  %v1611_v56 = vand.u32 4294901760, %v1610_v36  ;;  %v1621_v15 = vand.u32 4294901760, %v1620_v31 }
 0x208   :  { %v3955_v53 = vpack.c.bf16 %v1485_v20, %v1481_v18  ;;  %v1638_v58 = vsub.f32 %v2847_v0, %v1485_v20  ;;  %v2635_v19 = vpack.c.bf16 %v1617_v12, %v1605_v40  ;;  %v1628_v3 = vsub.f32 %v1626_v16, %v1627_v29 }
 0x209   :  { %v3957_v33 = vpack.c.bf16 %v1483_v17, %v1479_v47  ;;  %v1632_v62 = vsub.f32 %v2849_v43, %v1483_v17  ;;  %v2633_v32 = vpack.c.bf16 %v1611_v56, %v1599_v6  ;;  %v1540_v35 = vand.u32 4294901760, %v1539_v46 }
 0x20a   :  { %v1639_v24 = vand.u32 4294901760, %v1638_v58  ;;  %v2655_v59 = vpack.c.bf16 %v1638_v58, %v1626_v16  ;;  %v1622_v11 = vsub.f32 %v1620_v31, %v1621_v15  ;;  %v1629_v0 = vand.u32 4294901760, %v1628_v3 }
 0x20b   :  { %2622 = vmatprep.subr.bf16.mxu1 %v3957_v33  ;;  %v1633_v14 = vand.u32 4294901760, %v1632_v62  ;;  %v2653_v48 = vpack.c.bf16 %v1632_v62, %v1620_v31 }
 0x20c   :  { %2624 = vmatpush1.bf16.msra.mxu1 %v3955_v53  ;;  %v1640_v7 = vsub.f32 %v1638_v58, %v1639_v24  ;;  %v2687_v18 = vpack.c.bf16 %v1639_v24, %v1627_v29  ;;  %v1623_v43 = vand.u32 4294901760, %v1622_v11 }
 0x20d   :  { %2626 = vmatprep.subr.bf16.mxu1 %v3886_v54  ;;  %v1634_v40 = vsub.f32 %v1632_v62, %v1633_v14  ;;  %v2685_v47 = vpack.c.bf16 %v1633_v14, %v1621_v15 }
 0x20e   :  { %v1641_v36 = vand.u32 4294901760, %v1640_v7 }
 0x20f   :  { %1541 = vmatmul.mubr.f32.vlgmr.msra.gmra.mrb[16].mxu1 %v1540_v35  ;;  %v1635_v20 = vand.u32 4294901760, %v1634_v40 }
 0x210   :  { %2628 = vmatpush1.bf16.msra.mxu1 %v3880_v50  ;;  %v2639_v16 = vpack.c.bf16 %v1641_v36, %v1629_v0  ;;  %1691 = vmatprep.mubr.f32.mxu1 %v2875_v41 }
 0x211   :  { %2630 = vmatprep.subr.bf16.mxu1 %v2629_v23  ;;  %v2637_v46 = vpack.c.bf16 %v1635_v20, %v1623_v43 }
 0x214   :  { %2632 = vmatpush1.bf16.msra.mxu1 %v2631_v52 }
 0x215   :  { %2634 = vmatprep.subr.bf16.mxu1 %v2633_v32 }
 0x218   :  { %2636 = vmatpush1.bf16.msra.mxu1 %v2635_v19 }
 0x219   :  { %2638 = vmatprep.subr.bf16.mxu1 %v2637_v46 }
 0x21c   :  { %2640 = vmatpush1.bf16.msra.mxu1 %v2639_v16 }
 0x21d   :  { %2642 = vmatprep.subr.bf16.mxu1 %v2641_v37 }
 0x21f   :  { %1693 = vmatmul.mubr.f32.vlgmr.msra.gmra.mrb[16].mxu1 %v3828_v22 }
 0x220   :  { %2644 = vmatpush1.bf16.msra.mxu1 %v2643_v45  ;;  %1795 = vmatprep.mubr.f32.mxu1 %v2875_v41 }
 0x221   :  { %2646 = vmatprep.subr.bf16.mxu1 %v2645_v26 }
 0x224   :  { %2648 = vmatpush1.bf16.msra.mxu1 %v2647_v4 }
 0x225   :  { %2650 = vmatprep.subr.bf16.mxu1 %v2649_v2 }
 0x228   :  { %2652 = vmatpush1.bf16.msra.mxu1 %v2651_v28 }
 0x229   :  { %2654 = vmatprep.subr.bf16.mxu1 %v2653_v48 }
 0x22c   :  { %2656 = vmatpush1.bf16.msra.mxu1 %v2655_v59 }
 0x22d   :  { %2658 = vmatprep.subr.bf16.mxu1 %v3851_v25 }
 0x22f   :  { %1798 = vmatmul.mubr.f32.vlgmr.msra.gmra.mrb[16].mxu1 %v3831_v38  ;;  %v1449_v38 = vpop.permute.xlu0 %1448 }
 0x230   :  { %2660 = vmatpush1.bf16.msra.mxu1 %v3844_v5  ;;  %1884 = vmatprep.mubr.f32.mxu1 %v2875_v41 }
 0x231   :  { %2662 = vmatprep.subr.bf16.mxu1 %v3882_v61 }
 0x234   :  { %2664 = vmatpush1.bf16.msra.mxu1 %v3876_v1 }
 0x235   :  { %2666 = vmatprep.subr.bf16.mxu1 %v3925_v8 }
 0x238   :  { %2668 = vmatpush1.bf16.msra.mxu1 %v3914_v57 }
 0x239   :  { %2670 = vmatprep.subr.bf16.mxu1 %v3957_v33 }
 0x23c   :  { %2672 = vmatpush1.bf16.msra.mxu1 %v3955_v53 }
 0x23d   :  { %2674 = vmatprep.subr.bf16.mxu1 %v3911_v60 }
 0x23f   :  { %1888 = vmatmul.mubr.f32.vlgmr.msra.gmra.mrb[16].mxu1 %v1538_v42 }
 0x240   :  { %2676 = vmatpush1.bf16.msra.mxu1 %v3923_v21  ;;  %2006 = vmatprep.mubr.f32.mxu1 %v2875_v41 }
 0x241   :  { %2678 = vmatprep.subr.bf16.mxu1 %v3944_v13 }
 0x244   :  { %2680 = vmatpush1.bf16.msra.mxu1 %v3949_v10 }
 0x245   :  { %2682 = vmatprep.subr.bf16.mxu1 %v3951_v49 }
 0x248   :  { %2684 = vmatpush1.bf16.msra.mxu1 %v3953_v9 }
 0x249   :  { %2686 = vmatprep.subr.bf16.mxu1 %v2685_v47 }
 0x24c   :  { %2688 = vmatpush1.bf16.msra.mxu1 %v2687_v18 }
 0x24d   :  { %2690 = vmatprep.subr.bf16.mxu1 %v3851_v25 }
 0x24f   :  { %2008 = vmatmul.mubr.f32.vlgmr.msra.gmra.mrb[16].mxu1 %v3828_v22 }
 0x250   :  { %2692 = vmatpush1.bf16.msra.mxu1 %v3844_v5  ;;  %2094 = vmatprep.mubr.f32.mxu1 %v2875_v41 }
 0x251   :  { %2694 = vmatprep.subr.bf16.mxu1 %v3882_v61 }
 0x254   :  { %2696 = vmatpush1.bf16.msra.mxu1 %v3876_v1 }
 0x255   :  { %2698 = vmatprep.subr.bf16.mxu1 %v3925_v8 }
 0x258   :  { %2700 = vmatpush1.bf16.msra.mxu1 %v3914_v57 }
 0x259   :  { %2702 = vmatprep.subr.bf16.mxu1 %v3957_v33 }
 0x25c   :  { %2704 = vmatpush1.bf16.msra.mxu1 %v3955_v53 }
 0x25f   :  { %2096 = vmatmul.mubr.f32.vlgmr.msra.gmra.mrb[16].mxu1 %v3828_v22 }
 0x332   :  { %v2097_v63 = vpop.f32.mrb[16].mxu1 }
 0x333   :  { %v2737_v42 = vadd.f32 %v2097_v63, %v1449_v38  ;;  %v2099_v51 = vpop.f32.mrb[17].mxu1 }
 0x334   :  { %v2738_v41 = vadd.f32 %v2099_v51, %v1449_v38 }
 0x336   :  { %v2104_v5 = vcombine.low %v2737_v42, %v2738_v41 }
 0x338   :  { %2128 = vst.sshfl [vmem:[#allocation2] sm:$0x33 pattern:$0x76325410] %v2104_v5 }
 0x339   :  { %2861 = shalt.err (!%p2858_p4)
}
 0x33a   :  { %s2862_s17 = scalar_lea.hbm %s4025_s5, 64 }
 0x33b   :  { %p2863_p5 = scmp.ne.s32.totalorder %s4025_s5, %s2862_s17  ;;  %p2866_p6 = scmp.lt.u32.totalorder %s2862_s17, %s4025_s5 }
 0x33d   :  { %p2868_p7 = pnand %p2866_p6, %p2863_p5 }
 0x33f   :  { %2871 = shalt.err (!%p2868_p7)
}
 0x340   :  { %2123 = dma.vmem_to_hbm [thread:$0]  %s2121_s13, 64, %s4025_s5, [#allocation3]  }
 0x341   :  { %2872 = dma.done.wait [#allocation3], 64  }
 0x342   :  { %2873 = vsyncadd [#allocation3], 4294967232 }
 0x343   :  { %2127 = vsyncpa [#allocation3], 1 }

</bundles_post_ra>
